<compile_context>
chip_gen: v7x
topology: tpu7x:2x2x1
jax: 0.10.0
libtpu: 0.0.40
codegen_flags: <defaults>
</compile_context>

<pallas_src>
import functools

import jax
import jax.numpy as jnp
from jax.experimental import pallas as pl
from jax.experimental.pallas import tpu as pltpu

_LEAKY_SLOPE = 0.01   # F.leaky_relu default
_BN_EPS = 1e-5        # nn.BatchNorm2d default

# Tap order t = (dy+1)*3 + (dx+1); must match the fused-weight layout below.
_TAPS = tuple((dy, dx) for dy in (-1, 0, 1) for dx in (-1, 0, 1))


def _residual_block_kernel(x_ref, s1_ref, t1_ref, w1_ref, b1_ref,
                           w2_ref, b2_ref, o_ref, pad_ref, taps_ref, *, width):
    """x_ref: (Bt, C, N) block.  pad_ref: (C, N + 2*(W+1)).  taps_ref: (9C, Bt*N)."""
    Bt, C, N = x_ref.shape
    W = width
    P = W + 1                        # one-sided zero-pad width in the flat layout

    # ---- hoisted once per grid step -------------------------------------
    # Horizontal-boundary 0/1 masks as full (C, N) f32 so the unrolled tap
    # loop does a single vreg multiply (no where / re-broadcast per tap).
    xpos = jax.lax.broadcasted_iota(jnp.int32, (C, N), 1) % W
    mask_l = (xpos >= 1).astype(jnp.float32)        # for dx = -1 taps
    mask_r = (xpos < W - 1).astype(jnp.float32)     # for dx = +1 taps

    # Zero only the two side strips of the padded scratch (center is always
    # overwritten by a1).  Done every step — each TensorCore owns its scratch.
    zeros_strip = jnp.zeros((C, P), jnp.float32)
    pad_ref[:, pl.ds(0, P)] = zeros_strip
    pad_ref[:, pl.ds(P + N, P)] = zeros_strip

    # Parameters loaded once per grid step (hoisted out of the image loop).
    s1 = s1_ref[...]                 # (C, 1)   BN1 scale (inference affine)
    t1 = t1_ref[...]                 # (C, 1)   BN1 shift
    w1 = w1_ref[...]                 # (Cout, 9C) conv1 weights with BN2 folded
    b1 = b1_ref[...]                 # (Cout, 1)  conv1 bias with BN2 folded
    w2 = w2_ref[...]                 # (Cout, Cout) conv2 (1x1) weights
    b2 = b2_ref[...]                 # (Cout, 1)  conv2 bias

    # ---- stage the 9 shifted taps of every image in the block -----------
    xs = []
    for b in range(Bt):              # small static unroll over the batch block
        xb = x_ref[b]                                   # (C, N)
        xs.append(xb)
        z = xb * s1 + t1                                # bn1 (folded)
        a1 = jnp.maximum(z, _LEAKY_SLOPE * z)           # leaky_relu
        pad_ref[:, pl.ds(P, N)] = a1                    # center of padded row
        for t, (dy, dx) in enumerate(_TAPS):
            tap = pad_ref[:, pl.ds(P + dy * W + dx, N)]  # static offset 0..2W+2
            if dx == -1:
                tap = tap * mask_l
            elif dx == 1:
                tap = tap * mask_r
            taps_ref[pl.ds(t * C, C), pl.ds(b * N, N)] = tap

    # ---- one fused conv1 (3x3, BN2 folded) for the whole block -----------
    taps = taps_ref[...]                                # (9C, Bt*N)
    y1 = jnp.dot(w1, taps, preferred_element_type=jnp.float32) + b1
    a2 = jnp.maximum(y1, _LEAKY_SLOPE * y1)             # leaky_relu
    y2 = jnp.dot(w2, a2, preferred_element_type=jnp.float32) + b2   # 1x1 conv

    # ---- residual add + lane-dense stores (N is a multiple of 128) -------
    for b in range(Bt):
        o_ref[b] = (y2[:, b * N:(b + 1) * N] + xs[b]).astype(o_ref.dtype)


def _pick_block_b(B):
    """Per-generation batch blocking: 1 grid step on single-TC chips, >=2 on v7x."""
    kind = ""
    try:
        kind = jax.devices()[0].device_kind.lower()
    except Exception:
        pass
    single_tc = any(tag in kind for tag in ("v5e", "v5 lite", "v6e", "v6 lite"))
    if single_tc:
        return B                      # grid is a serial loop: fold batch into one step
    return 1 if B >= 2 else B         # keep >=2 parallel steps for two TensorCores


def residual_block(x_nchw, params, *, block_b=None):
    """x_nchw: (B, C, H, W) f32.  params: PyTorch-shaped conv/BN parameters."""
    B, C, H, W = x_nchw.shape
    N = H * W
    if block_b is None:
        block_b = _pick_block_b(B)
    assert B % block_b == 0

    w1, b1 = params["w1"], params["b1"]          # (Cout, C, 3, 3), (Cout,)
    w2, b2 = params["w2"], params["b2"]          # (Cout, Cout, 1, 1), (Cout,)
    Cout = w1.shape[0]
    assert Cout == C, "residual add requires d_out == d_in"

    # Fold BN1 (inference) into a per-channel scale/shift applied in-kernel.
    inv1 = params["g1"] / jnp.sqrt(params["rv1"] + _BN_EPS)
    s1 = inv1.reshape(C, 1).astype(jnp.float32)
    t1 = (params["be1"] - params["rm1"] * inv1).reshape(C, 1).astype(jnp.float32)

    # Fold BN2 (inference) into conv1: bn2(conv1(z)) == (w1*inv2)·z + (b1-rm2)*inv2+be2
    inv2 = params["g2"] / jnp.sqrt(params["rv2"] + _BN_EPS)
    w1_scaled = (w1 * inv2[:, None, None, None]).astype(jnp.float32)
    # (Cout, Cin, 3, 3) -> (Cout, 3, 3, Cin) -> (Cout, 9*Cin); column block
    # t = ky*3 + kx matches the tap-staging order in the kernel.
    w1f = jnp.transpose(w1_scaled, (0, 2, 3, 1)).reshape(Cout, 9 * C)
    b1f = ((b1 - params["rm2"]) * inv2 + params["be2"]).reshape(Cout, 1)
    b1f = b1f.astype(jnp.float32)

    w2f = w2.reshape(Cout, Cout).astype(jnp.float32)
    b2f = b2.reshape(Cout, 1).astype(jnp.float32)

    x = x_nchw.reshape(B, C, N).astype(jnp.float32)

    flops = B * N * (2 * Cout * 9 * C + 2 * Cout * Cout + 8 * C)
    bytes_accessed = 4 * (2 * B * C * N + 9 * Cout * C + Cout * Cout + 4 * Cout)

    out = pl.pallas_call(
        functools.partial(_residual_block_kernel, width=W),
        out_shape=jax.ShapeDtypeStruct((B, C, N), jnp.float32),
        grid_spec=pltpu.PrefetchScalarGridSpec(
            num_scalar_prefetch=0,
            grid=(B // block_b,),
            in_specs=[
                pl.BlockSpec((block_b, C, N), lambda b: (b, 0, 0)),   # x
                pl.BlockSpec((C, 1), lambda b: (0, 0)),               # bn1 scale
                pl.BlockSpec((C, 1), lambda b: (0, 0)),               # bn1 shift
                pl.BlockSpec((Cout, 9 * C), lambda b: (0, 0)),        # fused conv1 w
                pl.BlockSpec((Cout, 1), lambda b: (0, 0)),            # conv1 b (+BN2)
                pl.BlockSpec((Cout, Cout), lambda b: (0, 0)),         # conv2 w
                pl.BlockSpec((Cout, 1), lambda b: (0, 0)),            # conv2 b
            ],
            out_specs=pl.BlockSpec((block_b, C, N), lambda b: (b, 0, 0)),
            scratch_shapes=[
                pltpu.VMEM((C, N + 2 * (W + 1)), jnp.float32),        # padded a1 row
                pltpu.VMEM((9 * C, block_b * N), jnp.float32),        # staged taps
            ],
        ),
        compiler_params=pltpu.CompilerParams(
            dimension_semantics=("parallel",)),
        cost_estimate=pl.CostEstimate(
            flops=flops, transcendentals=0, bytes_accessed=bytes_accessed),
    )(x, s1, t1, w1f, b1f, w2f, b2f)

    return out.reshape(B, C, H, W)


def residual_block_reference(x, p):
    """Pure-JAX reference matching the PyTorch forward (inference-mode BN)."""
    def bn(v, gamma, beta, mean, var):
        inv = gamma / jnp.sqrt(var + _BN_EPS)
        return v * inv[None, :, None, None] + (beta - mean * inv)[None, :, None, None]

    def lrelu(v):
        return jnp.where(v >= 0, v, _LEAKY_SLOPE * v)

    dn = ("NCHW", "OIHW", "NCHW")
    a1 = lrelu(bn(x, p["g1"], p["be1"], p["rm1"], p["rv1"]))
    y1 = jax.lax.conv_general_dilated(
        a1, p["w1"], (1, 1), "SAME", dimension_numbers=dn,
        precision=jax.lax.Precision.HIGHEST) + p["b1"][None, :, None, None]
    a2 = lrelu(bn(y1, p["g2"], p["be2"], p["rm2"], p["rv2"]))
    y2 = jax.lax.conv_general_dilated(
        a2, p["w2"], (1, 1), "VALID", dimension_numbers=dn,
        precision=jax.lax.Precision.HIGHEST) + p["b2"][None, :, None, None]
    return y2 + x


if __name__ == "__main__":
    B, C, H, W = 2, 4, 16, 16

    key = jax.random.PRNGKey(0)
    ks = jax.random.split(key, 13)

    x = jax.random.normal(ks[0], (B, C, H, W), dtype=jnp.float32)
    params = dict(
        w1=jax.random.normal(ks[1], (C, C, 3, 3), jnp.float32) * 0.1,
        b1=jax.random.normal(ks[2], (C,), jnp.float32) * 0.1,
        w2=jax.random.normal(ks[3], (C, C, 1, 1), jnp.float32) * 0.2,
        b2=jax.random.normal(ks[4], (C,), jnp.float32) * 0.1,
        g1=1.0 + 0.1 * jax.random.normal(ks[5], (C,), jnp.float32),
        be1=0.1 * jax.random.normal(ks[6], (C,), jnp.float32),
        rm1=0.1 * jax.random.normal(ks[7], (C,), jnp.float32),
        rv1=jax.random.uniform(ks[8], (C,), jnp.float32, 0.5, 1.5),
        g2=1.0 + 0.1 * jax.random.normal(ks[9], (C,), jnp.float32),
        be2=0.1 * jax.random.normal(ks[10], (C,), jnp.float32),
        rm2=0.1 * jax.random.normal(ks[11], (C,), jnp.float32),
        rv2=jax.random.uniform(ks[12], (C,), jnp.float32, 0.5, 1.5),
    )

    out = residual_block(x, params)          # block_b auto-picked per generation
    out = jax.block_until_ready(out)

    ref = residual_block_reference(x, params)
    ref = jax.block_until_ready(ref)

    assert out.shape == (B, C, H, W)
    err = jnp.max(jnp.abs(out - ref))
    assert jnp.allclose(out, ref, atol=1e-4, rtol=1e-4), f"max abs err = {err}"
    print("KERNEL_OK")
</pallas_src>

<mosaic_0001>
module attributes {stable_mosaic.version = 11 : i64} {
  func.func @_residual_block_kernel(%arg0: i32, %arg1: memref<1x4x256xf32, #tpu.memory_space<vmem>>, %arg2: memref<4x1xf32, #tpu.memory_space<vmem>>, %arg3: memref<4x1xf32, #tpu.memory_space<vmem>>, %arg4: memref<4x36xf32, #tpu.memory_space<vmem>>, %arg5: memref<4x1xf32, #tpu.memory_space<vmem>>, %arg6: memref<4x4xf32, #tpu.memory_space<vmem>>, %arg7: memref<4x1xf32, #tpu.memory_space<vmem>>, %arg8: memref<1x4x256xf32, #tpu.memory_space<vmem>>, %arg9: memref<4x290xf32, #tpu.memory_space<vmem>>, %arg10: memref<36x256xf32, #tpu.memory_space<vmem>>) attributes {dimension_semantics = [#tpu.dimension_semantics<parallel>], iteration_bounds = array<i64: 2>, scalar_prefetch = 0 : i64, scratch_operands = 2 : i64, tpu.core_type = #tpu.core_type<tc>, window_params = [{transform_indices = @transform_0, window_bounds = array<i64: 1, 4, 256>}, {pipeline_mode = #tpu.pipeline_mode<synchronous>, transform_indices = @transform_1, window_bounds = array<i64: 4, 1>}, {pipeline_mode = #tpu.pipeline_mode<synchronous>, transform_indices = @transform_2, window_bounds = array<i64: 4, 1>}, {pipeline_mode = #tpu.pipeline_mode<synchronous>, transform_indices = @transform_3, window_bounds = array<i64: 4, 36>}, {pipeline_mode = #tpu.pipeline_mode<synchronous>, transform_indices = @transform_4, window_bounds = array<i64: 4, 1>}, {pipeline_mode = #tpu.pipeline_mode<synchronous>, transform_indices = @transform_5, window_bounds = array<i64: 4, 4>}, {pipeline_mode = #tpu.pipeline_mode<synchronous>, transform_indices = @transform_6, window_bounds = array<i64: 4, 1>}, {transform_indices = @transform_7, window_bounds = array<i64: 1, 4, 256>}]} {
    %0 = tpu.iota {dimensions = array<i32: 1>} : vector<4x256xi32>
    %c16_i32 = arith.constant 16 : i32
    %c0_i32 = arith.constant 0 : i32
    %1 = arith.cmpi eq, %c16_i32, %c0_i32 : i32
    %c1_i32 = arith.constant 1 : i32
    %2 = arith.select %1, %c1_i32, %c16_i32 : i32
    %3 = vector.broadcast %2 : i32 to vector<4x256xi32>
    %4 = arith.remsi %0, %3 : vector<4x256xi32>
    %c0_i32_0 = arith.constant 0 : i32
    %5 = vector.broadcast %c0_i32_0 : i32 to vector<4x256xi32>
    %6 = arith.cmpi ne, %4, %5 : vector<4x256xi32>
    %c0_i32_1 = arith.constant 0 : i32
    %7 = vector.broadcast %c0_i32_1 : i32 to vector<4x256xi32>
    %8 = arith.cmpi slt, %4, %7 : vector<4x256xi32>
    %c0_i32_2 = arith.constant 0 : i32
    %9 = arith.cmpi slt, %2, %c0_i32_2 : i32
    %10 = vector.broadcast %9 : i1 to vector<4x256xi1>
    %11 = vector.broadcast %10 : vector<4x256xi1> to vector<4x256xi1>
    %12 = arith.xori %8, %11 : vector<4x256xi1>
    %13 = arith.andi %12, %6 : vector<4x256xi1>
    %14 = vector.broadcast %2 : i32 to vector<4x256xi32>
    %15 = arith.addi %4, %14 : vector<4x256xi32>
    %16 = arith.select %13, %15, %4 : vector<4x256xi1>, vector<4x256xi32>
    %c1_i32_3 = arith.constant 1 : i32
    %17 = vector.broadcast %c1_i32_3 : i32 to vector<4x256xi32>
    %18 = arith.cmpi sge, %16, %17 : vector<4x256xi32>
    %19 = arith.extui %18 : vector<4x256xi1> to vector<4x256xi32>
    %20 = arith.sitofp %19 : vector<4x256xi32> to vector<4x256xf32>
    %c15_i32 = arith.constant 15 : i32
    %21 = vector.broadcast %c15_i32 : i32 to vector<4x256xi32>
    %22 = arith.cmpi slt, %16, %21 : vector<4x256xi32>
    %23 = arith.extui %22 : vector<4x256xi1> to vector<4x256xi32>
    %24 = arith.sitofp %23 : vector<4x256xi32> to vector<4x256xf32>
    %cst = arith.constant 0.000000e+00 : f32
    %25 = vector.broadcast %cst : f32 to vector<4x17xf32>
    %c0 = arith.constant 0 : index
    %c0_4 = arith.constant 0 : index
    %26 = vector.load %arg9[%c0, %c0_4] : memref<4x290xf32, #tpu.memory_space<vmem>>, vector<4x17xf32>
    tpu.vector_store %arg9[%c0, %c0_4], %25 {strides = array<i32>} : memref<4x290xf32, #tpu.memory_space<vmem>>, vector<4x17xf32>,
    %c0_5 = arith.constant 0 : index
    %c273 = arith.constant 273 : index
    %27 = vector.load %arg9[%c0_5, %c273] : memref<4x290xf32, #tpu.memory_space<vmem>>, vector<4x17xf32>
    tpu.vector_store %arg9[%c0_5, %c273], %25 {strides = array<i32>} : memref<4x290xf32, #tpu.memory_space<vmem>>, vector<4x17xf32>,
    %c0_6 = arith.constant 0 : index
    %c0_7 = arith.constant 0 : index
    %28 = vector.load %arg2[%c0_6, %c0_7] : memref<4x1xf32, #tpu.memory_space<vmem>>, vector<4x1xf32>
    %c0_8 = arith.constant 0 : index
    %c0_9 = arith.constant 0 : index
    %29 = vector.load %arg3[%c0_8, %c0_9] : memref<4x1xf32, #tpu.memory_space<vmem>>, vector<4x1xf32>
    %c0_10 = arith.constant 0 : index
    %c0_11 = arith.constant 0 : index
    %30 = vector.load %arg4[%c0_10, %c0_11] : memref<4x36xf32, #tpu.memory_space<vmem>>, vector<4x36xf32>
    %c0_12 = arith.constant 0 : index
    %c0_13 = arith.constant 0 : index
    %31 = vector.load %arg5[%c0_12, %c0_13] : memref<4x1xf32, #tpu.memory_space<vmem>>, vector<4x1xf32>
    %c0_14 = arith.constant 0 : index
    %c0_15 = arith.constant 0 : index
    %32 = vector.load %arg6[%c0_14, %c0_15] : memref<4x4xf32, #tpu.memory_space<vmem>>, vector<4x4xf32>
    %c0_16 = arith.constant 0 : index
    %c0_17 = arith.constant 0 : index
    %33 = vector.load %arg7[%c0_16, %c0_17] : memref<4x1xf32, #tpu.memory_space<vmem>>, vector<4x1xf32>
    %c0_18 = arith.constant 0 : index
    %c0_19 = arith.constant 0 : index
    %c0_20 = arith.constant 0 : index
    %34 = vector.load %arg1[%c0_18, %c0_19, %c0_20] : memref<1x4x256xf32, #tpu.memory_space<vmem>>, vector<1x4x256xf32>
    %35 = vector.shape_cast %34 : vector<1x4x256xf32> to vector<4x256xf32>
    %36 = vector.broadcast %28 : vector<4x1xf32> to vector<4x256xf32>
    %37 = arith.mulf %35, %36 : vector<4x256xf32>
    %38 = vector.broadcast %29 : vector<4x1xf32> to vector<4x256xf32>
    %39 = arith.addf %37, %38 : vector<4x256xf32>
    %cst_21 = arith.constant 0.00999999977 : f32
    %40 = vector.broadcast %cst_21 : f32 to vector<4x256xf32>
    %41 = arith.mulf %40, %39 : vector<4x256xf32>
    %42 = arith.maximumf %39, %41 : vector<4x256xf32>
    %c0_22 = arith.constant 0 : index
    %c17 = arith.constant 17 : index
    %43 = vector.load %arg9[%c0_22, %c17] : memref<4x290xf32, #tpu.memory_space<vmem>>, vector<4x256xf32>
    tpu.vector_store %arg9[%c0_22, %c17], %42 {strides = array<i32>} : memref<4x290xf32, #tpu.memory_space<vmem>>, vector<4x256xf32>,
    %c0_23 = arith.constant 0 : index
    %c0_24 = arith.constant 0 : index
    %44 = vector.load %arg9[%c0_23, %c0_24] : memref<4x290xf32, #tpu.memory_space<vmem>>, vector<4x256xf32>
    %45 = arith.mulf %44, %20 : vector<4x256xf32>
    %c0_25 = arith.constant 0 : index
    %c0_26 = arith.constant 0 : index
    %46 = vector.load %arg10[%c0_25, %c0_26] : memref<36x256xf32, #tpu.memory_space<vmem>>, vector<4x256xf32>
    tpu.vector_store %arg10[%c0_25, %c0_26], %45 {strides = array<i32>} : memref<36x256xf32, #tpu.memory_space<vmem>>, vector<4x256xf32>,
    %c0_27 = arith.constant 0 : index
    %c1 = arith.constant 1 : index
    %47 = vector.load %arg9[%c0_27, %c1] : memref<4x290xf32, #tpu.memory_space<vmem>>, vector<4x256xf32>
    %c4 = arith.constant 4 : index
    %c0_28 = arith.constant 0 : index
    %48 = vector.load %arg10[%c4, %c0_28] : memref<36x256xf32, #tpu.memory_space<vmem>>, vector<4x256xf32>
    tpu.vector_store %arg10[%c4, %c0_28], %47 {strides = array<i32>} : memref<36x256xf32, #tpu.memory_space<vmem>>, vector<4x256xf32>,
    %c0_29 = arith.constant 0 : index
    %c2 = arith.constant 2 : index
    %49 = vector.load %arg9[%c0_29, %c2] : memref<4x290xf32, #tpu.memory_space<vmem>>, vector<4x256xf32>
    %50 = arith.mulf %49, %24 : vector<4x256xf32>
    %c8 = arith.constant 8 : index
    %c0_30 = arith.constant 0 : index
    %51 = vector.load %arg10[%c8, %c0_30] : memref<36x256xf32, #tpu.memory_space<vmem>>, vector<4x256xf32>
    tpu.vector_store %arg10[%c8, %c0_30], %50 {strides = array<i32>} : memref<36x256xf32, #tpu.memory_space<vmem>>, vector<4x256xf32>,
    %c0_31 = arith.constant 0 : index
    %c16 = arith.constant 16 : index
    %52 = vector.load %arg9[%c0_31, %c16] : memref<4x290xf32, #tpu.memory_space<vmem>>, vector<4x256xf32>
    %53 = arith.mulf %52, %20 : vector<4x256xf32>
    %c12 = arith.constant 12 : index
    %c0_32 = arith.constant 0 : index
    %54 = vector.load %arg10[%c12, %c0_32] : memref<36x256xf32, #tpu.memory_space<vmem>>, vector<4x256xf32>
    tpu.vector_store %arg10[%c12, %c0_32], %53 {strides = array<i32>} : memref<36x256xf32, #tpu.memory_space<vmem>>, vector<4x256xf32>,
    %c0_33 = arith.constant 0 : index
    %c17_34 = arith.constant 17 : index
    %55 = vector.load %arg9[%c0_33, %c17_34] : memref<4x290xf32, #tpu.memory_space<vmem>>, vector<4x256xf32>
    %c16_35 = arith.constant 16 : index
    %c0_36 = arith.constant 0 : index
    %56 = vector.load %arg10[%c16_35, %c0_36] : memref<36x256xf32, #tpu.memory_space<vmem>>, vector<4x256xf32>
    tpu.vector_store %arg10[%c16_35, %c0_36], %55 {strides = array<i32>} : memref<36x256xf32, #tpu.memory_space<vmem>>, vector<4x256xf32>,
    %c0_37 = arith.constant 0 : index
    %c18 = arith.constant 18 : index
    %57 = vector.load %arg9[%c0_37, %c18] : memref<4x290xf32, #tpu.memory_space<vmem>>, vector<4x256xf32>
    %58 = arith.mulf %57, %24 : vector<4x256xf32>
    %c20 = arith.constant 20 : index
    %c0_38 = arith.constant 0 : index
    %59 = vector.load %arg10[%c20, %c0_38] : memref<36x256xf32, #tpu.memory_space<vmem>>, vector<4x256xf32>
    tpu.vector_store %arg10[%c20, %c0_38], %58 {strides = array<i32>} : memref<36x256xf32, #tpu.memory_space<vmem>>, vector<4x256xf32>,
    %c0_39 = arith.constant 0 : index
    %c32 = arith.constant 32 : index
    %60 = vector.load %arg9[%c0_39, %c32] : memref<4x290xf32, #tpu.memory_space<vmem>>, vector<4x256xf32>
    %61 = arith.mulf %60, %20 : vector<4x256xf32>
    %c24 = arith.constant 24 : index
    %c0_40 = arith.constant 0 : index
    %62 = vector.load %arg10[%c24, %c0_40] : memref<36x256xf32, #tpu.memory_space<vmem>>, vector<4x256xf32>
    tpu.vector_store %arg10[%c24, %c0_40], %61 {strides = array<i32>} : memref<36x256xf32, #tpu.memory_space<vmem>>, vector<4x256xf32>,
    %c0_41 = arith.constant 0 : index
    %c33 = arith.constant 33 : index
    %63 = vector.load %arg9[%c0_41, %c33] : memref<4x290xf32, #tpu.memory_space<vmem>>, vector<4x256xf32>
    %c28 = arith.constant 28 : index
    %c0_42 = arith.constant 0 : index
    %64 = vector.load %arg10[%c28, %c0_42] : memref<36x256xf32, #tpu.memory_space<vmem>>, vector<4x256xf32>
    tpu.vector_store %arg10[%c28, %c0_42], %63 {strides = array<i32>} : memref<36x256xf32, #tpu.memory_space<vmem>>, vector<4x256xf32>,
    %c0_43 = arith.constant 0 : index
    %c34 = arith.constant 34 : index
    %65 = vector.load %arg9[%c0_43, %c34] : memref<4x290xf32, #tpu.memory_space<vmem>>, vector<4x256xf32>
    %66 = arith.mulf %65, %24 : vector<4x256xf32>
    %c32_44 = arith.constant 32 : index
    %c0_45 = arith.constant 0 : index
    %67 = vector.load %arg10[%c32_44, %c0_45] : memref<36x256xf32, #tpu.memory_space<vmem>>, vector<4x256xf32>
    tpu.vector_store %arg10[%c32_44, %c0_45], %66 {strides = array<i32>} : memref<36x256xf32, #tpu.memory_space<vmem>>, vector<4x256xf32>,
    %c0_46 = arith.constant 0 : index
    %c0_47 = arith.constant 0 : index
    %68 = vector.load %arg10[%c0_46, %c0_47] : memref<36x256xf32, #tpu.memory_space<vmem>>, vector<36x256xf32>
    %cst_48 = arith.constant dense<0.000000e+00> : vector<4x256xf32>
    %69 = tpu.matmul %30, %68, %cst_48 {dimension_numbers = #tpu.dot_dimension_numbers<[1], [0], [0], [1], [0, 0, 1, 1], [], []>} : vector<4x36xf32>, vector<36x256xf32>, vector<4x256xf32> -> vector<4x256xf32>
    %70 = vector.broadcast %31 : vector<4x1xf32> to vector<4x256xf32>
    %71 = arith.addf %69, %70 : vector<4x256xf32>
    %cst_49 = arith.constant 0.00999999977 : f32
    %72 = vector.broadcast %cst_49 : f32 to vector<4x256xf32>
    %73 = arith.mulf %72, %71 : vector<4x256xf32>
    %74 = arith.maximumf %71, %73 : vector<4x256xf32>
    %cst_50 = arith.constant dense<0.000000e+00> : vector<4x256xf32>
    %75 = tpu.matmul %32, %74, %cst_50 {dimension_numbers = #tpu.dot_dimension_numbers<[1], [0], [0], [1], [0, 0, 1, 1], [], []>} : vector<4x4xf32>, vector<4x256xf32>, vector<4x256xf32> -> vector<4x256xf32>
    %76 = vector.broadcast %33 : vector<4x1xf32> to vector<4x256xf32>
    %77 = arith.addf %75, %76 : vector<4x256xf32>
    %78 = arith.addf %77, %35 : vector<4x256xf32>
    %c0_51 = arith.constant 0 : index
    %c0_52 = arith.constant 0 : index
    %c0_53 = arith.constant 0 : index
    %79 = vector.load %arg8[%c0_51, %c0_52, %c0_53] : memref<1x4x256xf32, #tpu.memory_space<vmem>>, vector<1x4x256xf32>
    %80 = vector.shape_cast %79 : vector<1x4x256xf32> to vector<4x256xf32>
    %81 = vector.shape_cast %78 : vector<4x256xf32> to vector<1x4x256xf32>
    tpu.vector_store %arg8[%c0_51, %c0_52, %c0_53], %81 {strides = array<i32>} : memref<1x4x256xf32, #tpu.memory_space<vmem>>, vector<1x4x256xf32>,
    return
  }
  func.func @transform_0(%arg0: i32) -> (i32, i32, i32) {
    %c0_i32 = arith.constant 0 : i32
    %c0_i32_0 = arith.constant 0 : i32
    %c0_i32_1 = arith.constant 0 : i32
    return %arg0, %c0_i32, %c0_i32_0 : i32, i32, i32
  }
  func.func @transform_1(%arg0: i32) -> (i32, i32) {
    %c0_i32 = arith.constant 0 : i32
    %c0_i32_0 = arith.constant 0 : i32
    %c0_i32_1 = arith.constant 0 : i32
    return %c0_i32, %c0_i32_0 : i32, i32
  }
  func.func @transform_2(%arg0: i32) -> (i32, i32) {
    %c0_i32 = arith.constant 0 : i32
    %c0_i32_0 = arith.constant 0 : i32
    %c0_i32_1 = arith.constant 0 : i32
    return %c0_i32, %c0_i32_0 : i32, i32
  }
  func.func @transform_3(%arg0: i32) -> (i32, i32) {
    %c0_i32 = arith.constant 0 : i32
    %c0_i32_0 = arith.constant 0 : i32
    %c0_i32_1 = arith.constant 0 : i32
    return %c0_i32, %c0_i32_0 : i32, i32
  }
  func.func @transform_4(%arg0: i32) -> (i32, i32) {
    %c0_i32 = arith.constant 0 : i32
    %c0_i32_0 = arith.constant 0 : i32
    %c0_i32_1 = arith.constant 0 : i32
    return %c0_i32, %c0_i32_0 : i32, i32
  }
  func.func @transform_5(%arg0: i32) -> (i32, i32) {
    %c0_i32 = arith.constant 0 : i32
    %c0_i32_0 = arith.constant 0 : i32
    %c0_i32_1 = arith.constant 0 : i32
    return %c0_i32, %c0_i32_0 : i32, i32
  }
  func.func @transform_6(%arg0: i32) -> (i32, i32) {
    %c0_i32 = arith.constant 0 : i32
    %c0_i32_0 = arith.constant 0 : i32
    %c0_i32_1 = arith.constant 0 : i32
    return %c0_i32, %c0_i32_0 : i32, i32
  }
  func.func @transform_7(%arg0: i32) -> (i32, i32, i32) {
    %c0_i32 = arith.constant 0 : i32
    %c0_i32_0 = arith.constant 0 : i32
    %c0_i32_1 = arith.constant 0 : i32
    return %arg0, %c0_i32, %c0_i32_0 : i32, i32, i32
  }
}

</mosaic_0001>

<bundles_post_ra>
// kernel: tpu_custom_call.1
= control target key start
LH: loop header
LB: loop body
LE: loop exit
PB: predicated region body
PF: predicated region fallthrough
CT: control target
= control target key end

     0   :  { %12 = vsyncpa [#allocation5], 0  ;;  %s1223_s0 = inlined_call_operand.vmem [shape: f32[2,4,256], index: 0, kind: input, shape index: {}]   ;;  %s1224_s1 = inlined_call_operand.vmem [shape: f32[4,1], index: 1, kind: input, shape index: {}]   ;;  %s1225_s2 = inlined_call_operand.vmem [shape: f32[4,1], index: 2, kind: input, shape index: {}]   ;;  %s1226_s3 = inlined_call_operand.vmem [shape: f32[4,36], index: 3, kind: input, shape index: {}]   ;;  %s1227_s4 = inlined_call_operand.vmem [shape: f32[4,1], index: 4, kind: input, shape index: {}]   ;;  %s1228_s5 = inlined_call_operand.vmem [shape: f32[4,4], index: 5, kind: input, shape index: {}]   ;;  %s1229_s6 = inlined_call_operand.vmem [shape: f32[4,1], index: 6, kind: input, shape index: {}]   ;;  %s1230_s7 = inlined_call_operand.hbm [shape: f32[2,4,256], index: 7, kind: output, shape index: {}]  }
   0x1   :  { %14 = vsyncpa [#allocation5 + $0x1], 0  ;;  %s1062_s24 = smov 0   ;;  %s1064_s25 = smov 0  }
   0x2   :  { %s1066_s26 = smov 0   ;;  %s1068_s27 = smov 0  }
   0x3 LB: > { %s1083_s28 = sadd.s32 4294967295, %s1002_s27   ;;  %s846_s29 = sadd.s32 4294967294, %s1002_s27   ;;  %s1002_s27 = sphi %s1068_s27, %s1236_s27   ;;  %s998_s26 = sphi %s1066_s26, %s1235_s26   ;;  %s994_s25 = sphi %s1064_s25, %s1234_s25   ;;  %s990_s24 = sphi %s1062_s24, %s1233_s24  }
   0x4   : > { %s1087_s30 = sadd.s32 1, %s1002_s27   ;;  %s179_s8 = sadd.s32 1, %s998_s26 }
   0x5   : > { %s176_s9 = ssub.s32 %s1002_s27, %s1087_s30  ;;  %p189_p0 = scmp.ne.s32.totalorder %s998_s26, %s994_s25 }
   0x6   : > { %p177_p1 = scmp.eq.s32.totalorder %s176_s9, 0  ;;  %p190_p2 = scmp.eq.s32.totalorder %s1083_s28, 1 }
   0x7   : > { %p195_p3 = scmp.ne.s32.totalorder %s994_s25, %s990_s24  ;;  %p196_p4 = scmp.eq.s32.totalorder %s846_s29, 1 }
   0x8   : > { %s1098_s10 = scalar_select %p177_p1, %s998_s26, %s179_s8  }
   0x9   : > { %p1100_p5 = por %p190_p2, %p189_p0  ;;  %p1104_p6 = por %p196_p4, %p195_p3 }
   0xa   : > { %p849_p7 = scmp.ge.s32.totalorder %s1002_s27, 1  ;;  %p240_p8 = scmp.lt.s32.totalorder %s1002_s27, 3 }
   0xc   : > { %p241_p9 = pnand %p849_p7, %p240_p8 }
   0xd   : > { %v320_v0 = vld [vmem:[%s1224_s1] sm:$0xf] (!%p241_p9)  ;;  %v1004_v1 = vmov (!%p241_p9), 0   ;;  %v277_v3 = vlaneseq (!%p241_p9)  ;;  %v1005_v8 = vmov (!%p241_p9), 0.0   ;;  %s1006_s17 = smov (!%p241_p9), 16   ;;  %s1007_s18 = smov (!%p241_p9), 18  }
   0xe   : > { %244 = sbr.rel (%p241_p9) target bundleno = 905 (0x389), region = 48  ;;  %934 = vset.pattern.permute.xlu0 (!%p241_p9), %v1004_v1  ;;  %935 = vset.pattern.permute.xlu1 (!%p241_p9), %v1004_v1  ;;  %v321_v2 = vld [vmem:[%s1225_s2] sm:$0xf] (!%p241_p9)  ;;  %vm316_vm4 = vcmask (!%p241_p9), 134144   ;;  %vm318_vm5 = vcmask (!%p241_p9), 273544   ;;  %p272_p10 = scmp.lt.s32.totalorder (!%p241_p9), %s1083_s28, 1 }
   0xf   : > { %329 = vperm.xlu0 (!%p241_p9), %934, %v320_v0   ;;  %v278_v4 = vand.u32 (!%p241_p9), 127, %v277_v3  ;;  %665 = vmatprep.mubr.f32.mxu0 (!%p241_p9), %v1005_v8  ;;  %317 = vst.msk [vmem:[#allocation2] sm:$0xf] (!%p241_p9), %vm316_vm4, %v1005_v8  ;;  %v1008_v15 = vmov (!%p241_p9), 839922192   ;;  %v335_v18 = vshrl.u32 (!%p241_p9), %v277_v3, 7 }
  0x10   : > { %755 = vmatprep.mubr.f32.mxu1 (!%p241_p9), %v1005_v8  ;;  %319 = vst.msk [vmem:[#allocation2 + $0x8] sm:$0xf] (!%p241_p9), %vm318_vm5, %v1005_v8  ;;  %v332_v16 = vunpack.c.l.s4 (!%p241_p9), %v1008_v15  ;;  %s1009_s29 = smov (!%p241_p9), 17   ;;  %s1010_s8 = smov (!%p241_p9), 2   ;;  %vm363_vm6 = vcmask (!%p241_p9), 1043592   ;;  %vm364_vm7 = vcmask (!%p241_p9), 1047556  }
  0x11   : > { %v279_v5 = vadd.s32 (!%p241_p9), 128, %v278_v4  ;;  %v284_v6 = vand.u32 (!%p241_p9), 15, %v278_v4  ;;  %s1011_s9 = smov (!%p241_p9), 32   ;;  %s1012_s13 = smov (!%p241_p9), 34   ;;  %vm359_vm8 = vcmask (!%p241_p9), 138240   ;;  %vm365_vm9 = vmor (!%p241_p9), %vm364_vm7, %vm363_vm6  ;;  %vm433_vm10 = vcmask (!%p241_p9), 130048  }
  0x12   : > { %v333_v17 = vunpack.c.0.s8 (!%p241_p9), %v332_v16  ;;  %s1013_s14 = smov (!%p241_p9), 111   ;;  %s1014_s15 = smov (!%p241_p9), 95   ;;  %vm406_vm11 = vcmask (!%p241_p9), 15360   ;;  %vm479_vm12 = vcmask (!%p241_p9), 146432   ;;  %vm507_vm13 = vcmask (!%p241_p9), 261120  }
  0x13   : > { %342 = vperm.xlu0 (!%p241_p9), %934, %v321_v2   ;;  %v291_v7 = vand.u32 (!%p241_p9), 15, %v279_v5  ;;  %vm304_vm0 = vcmp.ge.s32.totalorder (!%p241_p9), %v284_v6, 1  ;;  %vm310_vm2 = vcmp.lt.s32.totalorder (!%p241_p9), %v284_v6, 15  ;;  %s1015_s16 = smov (!%p241_p9), 127   ;;  %vm553_vm14 = vcmask (!%p241_p9), 277504   ;;  %s1020_s21 = smov (!%p241_p9), 94  }
  0x14   : > { %v853_v9 = vsel (!%p241_p9), %vm304_vm0, 1.0, %v1005_v8  ;;  %v855_v12 = vsel (!%p241_p9), %vm310_vm2, 1.0, %v1005_v8  ;;  %v336_v19 = vsub.s32 (!%p241_p9), %v333_v17, %v335_v18  ;;  %vm391_vm15 = vcmask (!%p241_p9), 1039360  }
  0x15   : > { %vm305_vm1 = vcmp.ge.s32.totalorder %v291_v7, 1  ;;  %vm311_vm3 = vcmp.lt.s32.totalorder %v291_v7, 15  ;;  %s273_s19 = scalar_select %p272_p10, %s1083_s28, 1  ;;  %vm541_vm0 = vcmask 777216   ;;  %vm495_vm2 = vcmask 900096  }
  0x16   : > { %v854_v10 = vsel %vm305_vm1, 1.0, %v1005_v8  ;;  %v856_v13 = vsel %vm311_vm3, 1.0, %v1005_v8  ;;  %vm467_vm1 = vcmask 908288   ;;  %vm421_vm3 = vcmask 1031168  }
  0x17   : > { %v371_v11 = vcombine.low %v853_v9, %v854_v10  ;;  %v402_v14 = vcombine.low %v855_v12, %v856_v13  ;;  %s868_s20 = sshll.u32 %s273_s19, 3  ;;  %s1018_s19 = smov 112   ;;  %v323_v13 = vld [vmem:[%s1227_s4] sm:$0xf]  ;;  %vm522_vm5 = vcmask 785408   ;;  %vm568_vm6 = vcmask 769024  }
  0x18   : > { %s276_s23 = scalar_lea.vmem %s1223_s0, %s868_s20  ;;  %s1019_s20 = smov 110   ;;  %vm594_vm7 = vcmask 1043456  }
  0x19   : > { %430 = vrot.lane.b32.xlu0 %v371_v11, %s1006_s17  ;;  %v1122_v22 = vld [vmem:[%s276_s23] sm:$0xff]  ;;  %s1016_s17 = smov 96  }
  0x1d   : > { %476 = vrot.lane.b32.xlu0 %v402_v14, %s1007_s18  ;;  %s1017_s18 = smov 126  }
  0x8e   : > { %v330_v20 = vpop.permute.xlu0 %329 }
  0x8f   : > { %v337_v21 = vrot.slane %v330_v20, %v336_v19 }
  0x91   : > { %v339_v24 = vmul.f32 %v337_v21, %v1122_v22 }
  0x92   : > { %v343_v23 = vpop.permute.xlu0 %342 }
  0x93   : > { %v350_v25 = vrot.slane %v343_v23, %v336_v19 }
  0x95   : > { %v352_v26 = vadd.f32 %v350_v25, %v339_v24 }
  0x96   : > { %v431_v39 = vpop.permute.xlu0 %430 }
  0x97   : > { %v353_v27 = vmul.f32 0.01, %v352_v26  ;;  %v432_v42 = vrot.slane %v431_v39, 4 }
  0x99   : > { %v354_v28 = vmax.f32 %v352_v26, %v353_v27  ;;  %v434_v47 = vsel %vm433_vm10, %v432_v42, %v431_v39 }
  0x9a   : > { %v477_v49 = vpop.permute.xlu0 %476 }
  0x9b   : > { %356 = vrot.lane.b32.xlu1 %v354_v28, %s1009_s29  ;;  %v478_v52 = vrot.slane %v477_v49, 4 }
  0x9d   : > { %v480_v58 = vsel %vm479_vm12, %v478_v52, %v477_v49 }
  0x9f   : > { %403 = vrot.lane.b32.xlu1 %v402_v14, %s1010_s8 }
  0xa3   : > { %504 = vrot.lane.b32.xlu1 %v371_v11, %s1011_s9 }
  0xa7   : > { %550 = vrot.lane.b32.xlu1 %v402_v14, %s1012_s13 }
 0x10d   : > { %v357_v29 = vpop.permute.xlu1 %356 }
 0x10e   : > { %v358_v30 = vrot.slane %v357_v29, 4 }
 0x110   : > { %v360_v31 = vsel %vm359_vm8, %v358_v30, %v357_v29  ;;  %367 = vst.msk [vmem:[#allocation2 + $0x8] sm:$0xf] %vm316_vm4, %v358_v30  ;;  %vm449_vm4 = vcmask 916480   ;;  %vm590_vm8 = vcmask 293888  }
 0x111   : > { %366 = vst.msk [vmem:[#allocation2] sm:$0xff] %vm365_vm9, %v360_v31  ;;  %v404_v32 = vpop.permute.xlu1 %403  ;;  %vm681_vm9 = vcmask 31744  }
 0x112   : > { %v405_v43 = vrot.slane %v404_v32, 4 }
 0x114   : > { %v407_v50 = vsel %vm406_vm11, %v405_v43, %v404_v32 }
 0x115   : > { %v505_v34 = vpop.permute.xlu1 %504 }
 0x116   : > { %v506_v36 = vrot.slane %v505_v34, 4 }
 0x117   : > { %v457_v35 = vld [vmem:[#allocation2 + $0x8] sm:$0xf] }
 0x118   : > { %v1126_v33 = vld [vmem:[#allocation2] sm:$0xff]  ;;  %465 = vrot.lane.b32.xlu0 %v457_v35, %s1013_s14  ;;  %v503_v37 = vld [vmem:[#allocation2 + $0x8] sm:$0xf]  ;;  %v508_v62 = vsel %vm507_vm13, %v506_v36, %v505_v34 }
 0x119   : > { %537 = vrot.lane.b32.xlu1 %v1126_v33, %s1014_s15  ;;  %v373_v38 = vmul.f32 %v371_v11, %v1126_v33  ;;  %v512_v40 = vmul.f32 %v506_v36, %v503_v37  ;;  %v938_v44 = vld [vmem:[#allocation2 + $0x8] ss:$0 sps:$4 sm:$0xff]   ;;  %v437_v51 = vmul.f32 %v434_v47, %v1126_v33  ;;  %v410_v53 = vmul.f32 %v407_v50, %v1126_v33  ;;  %v551_v63 = vpop.permute.xlu1 %550 }
 0x11a   : > { %v399_v45 = vld [vmem:[#allocation2 + $0x8] sm:$0xf]  ;;  %v533_v56 = vcombine.low %v1126_v33, %v1126_v33  ;;  %v460_v57 = vcombine.high %v1126_v33, %v1126_v33  ;;  %v483_v60 = vmul.f32 %v480_v58, %v1126_v33  ;;  %v511_v2 = vmul.f32 %v508_v62, %v1126_v33 }
 0x11b   : > { %v375_v41 = vcombine.high %v373_v38, %v373_v38  ;;  %377 = vst [vmem:[#allocation3] sm:$0xf] %v373_v38  ;;  %v939_v46 = vld [vmem:[#allocation2 + $0x8] ss:$0 sps:$4 sm:$0xff]   ;;  %v411_v48 = vmul.f32 %v405_v43, %v399_v45  ;;  %v414_v0 = vcombine.high %v410_v53, %v410_v53  ;;  %v552_v3 = vrot.slane %v551_v63, 4 }
 0x11c   : > { %387 = vrot.lane.b32.xlu0 %v1126_v33, %s1015_s16  ;;  %v475_v54 = vld [vmem:[#allocation2 + $0x8] sm:$0xf]  ;;  %v441_v4 = vcombine.low %v437_v51, %v437_v51  ;;  %v487_v7 = vcombine.low %v483_v60, %v483_v60  ;;  %v515_v9 = vcombine.high %v511_v2, %v511_v2 }
 0x11d   : > { %461 = vrot.lane.b32.xlu1 %v1126_v33, %s1013_s14  ;;  %378 = vst [vmem:[#allocation3 + $0x8] sm:$0xf] %v375_v41  ;;  %v484_v55 = vmul.f32 %v478_v52, %v475_v54  ;;  %v429_v61 = vld [vmem:[#allocation2 + $0x8] sm:$0xf]  ;;  %v554_v6 = vsel %vm553_vm14, %v552_v3, %v551_v63 }
 0x11e   : > { %v438_v1 = vmul.f32 %v432_v42, %v429_v61  ;;  %v557_v8 = vmul.f32 %v554_v6, %v1126_v33  ;;  %v549_v11 = vld [vmem:[#allocation2 + $0x8] sm:$0xf]  ;;  %v325_v6 = vld [vmem:[%s1229_s6] sm:$0xf] }
 0x11f   : > { %v488_v59 = vcombine.low %v484_v55, %v484_v55  ;;  %v558_v12 = vmul.f32 %v552_v3, %v549_v11 }
 0x120   : > { %520 = vrot.lane.b32.xlu0 %v512_v40, %s1016_s17  ;;  %v442_v5 = vcombine.low %v438_v1, %v438_v1  ;;  %v561_v10 = vcombine.high %v557_v8, %v557_v8 }
 0x121   : > { %389 = vrot.lane.b32.xlu1 %v938_v44, %s1015_s16 }
 0x124   : > { %539 = vrot.lane.b32.xlu0 %v939_v46, %s1014_s15 }
 0x125   : > { %419 = vrot.lane.b32.xlu1 %v411_v48, %s1017_s18 }
 0x128   : > { %445 = vrot.lane.b32.xlu0 %v437_v51, %s1018_s19 }
 0x129   : > { %415 = vrot.lane.b32.xlu1 %v410_v53, %s1017_s18 }
 0x12c   : > { %385 = vrot.lane.b32.xlu0 %v533_v56, %s1015_s16  ;;  %s269_s16 = sand.u32 1, %s994_s25  }
 0x12d   : > { %463 = vrot.lane.b32.xlu1 %v460_v57, %s1013_s14  ;;  %s773_s29 = scalar_lea.sflag [#allocation5], %s269_s16 }
 0x130   : > { %493 = vrot.lane.b32.xlu0 %v488_v59, %s1019_s20 }
 0x131   : > { %491 = vrot.lane.b32.xlu1 %v483_v60, %s1019_s20 }
 0x134   : > { %417 = vrot.lane.b32.xlu0 %v414_v0, %s1017_s18  ;;  %s869_s18 = sshll.u32 %s1083_s28, 7  ;;  %s1021_s28 = smov [#allocation4]  }
 0x135   : > { %516 = vrot.lane.b32.xlu1 %v511_v2, %s1016_s17  ;;  %s1181_s23 = scalar_lea.hbm %s1230_s7, %s869_s18  ;;  %s944_s9 = sshll.u32 %s1021_s28, 4  ;;  %s945_s9 = int_to_ptr.vmem [resolvable:$false] %s944_s9 }
 0x136   : > { %s946_s13 = scalar_lea.vmem %s945_s9, 256 }
 0x138   : > { %443 = vrot.lane.b32.xlu0 %v441_v4, %s1018_s19 }
 0x139   : > { %447 = vrot.lane.b32.xlu1 %v442_v5, %s1018_s19  ;;  %v322_v5 = vld [vmem:[%s1226_s3] sm:$0xf] }
 0x13c   : > { %489 = vrot.lane.b32.xlu0 %v487_v7, %s1019_s20 }
 0x13d   : > { %518 = vrot.lane.b32.xlu1 %v515_v9, %s1016_s17  ;;  %s850_s17 = sshll.u32 %s269_s16, 3 }
 0x13e   : > { %s271_s19 = scalar_lea.vmem [#allocation4], %s850_s17 }
 0x13f   : > { %s787_s20 = sshll.u32 %s271_s19, 4  ;;  %s1183_s20 = int_to_ptr.vmem [resolvable:$true] %s787_s20 }
 0x140   : > { %535 = vrot.lane.b32.xlu0 %v533_v56, %s1014_s15  ;;  %s940_s8 = scalar_lea.vmem %s1183_s20, 128  ;;  %p947_p0 = scmp.lt.s32.totalorder %s1183_s20, %s945_s9 }
 0x141   : > { %564 = vrot.lane.b32.xlu1 %v561_v10, %s1020_s21  ;;  %p941_p11 = scmp.ne.s32.totalorder %s1183_s20, %s940_s8  ;;  %p948_p1 = scmp.lt.s32.totalorder %s946_s13, %s940_s8 }
 0x143   : > { %p942_p12 = pnand %p941_p11, %p1100_p5  ;;  %p949_p2 = por %p948_p1, %p947_p0 }
 0x144   : > { %566 = vrot.lane.b32.xlu0 %v558_v12, %s1020_s21 }
 0x145   : > { %562 = vrot.lane.b32.xlu1 %v557_v8, %s1020_s21  ;;  %p943_p13 = pneg %p942_p12 }
 0x147   : > { %p950_p3 = pnand %p949_p2, %p943_p13 }
 0x148   : > { %587 = vperm.xlu0 %934, %v323_v13  }
 0x149   : > { %678 = vperm.xlu1 %935, %v325_v6  }
 0x18a   : > { %v466_v14 = vpop.permute.xlu0 %465 }
 0x18b   : > { %v538_v15 = vpop.permute.xlu1 %537 }
 0x18e   : > { %v388_v16 = vpop.permute.xlu0 %387 }
 0x18f   : > { %v462_v17 = vpop.permute.xlu1 %461 }
 0x192   : > { %v521_v18 = vpop.permute.xlu0 %520 }
 0x193   : > { %v390_v19 = vpop.permute.xlu1 %389 }
 0x194   : > { %v393_v20 = vsel %vm391_vm15, %v388_v16, %v390_v19  ;;  %v763_v19 = vcombine.high %v1122_v22, %v1122_v22 }
 0x195   : > { %397 = vst [vmem:[#allocation3 + $0x8] sm:$0xf0] %v393_v20 }
 0x196   : > { %v540_v21 = vpop.permute.xlu0 %539 }
 0x197   : > { %v543_v23 = vsel %vm541_vm0, %v538_v15, %v540_v21  ;;  %v420_v24 = vpop.permute.xlu1 %419 }
 0x198   : > { %547 = vst [vmem:[#allocation3 + $0x38] sm:$0xf0] %v543_v23 }
 0x19a   : > { %v446_v25 = vpop.permute.xlu0 %445 }
 0x19b   : > { %v416_v26 = vpop.permute.xlu1 %415 }
 0x19c   : > { %v576_v52 = vld [vmem:[#allocation3 + $0x8] sm:$0xff] }
 0x19e   : > { %v386_v27 = vpop.permute.xlu0 %385 }
 0x19f   : > { %v392_v28 = vsel %vm391_vm15, %v386_v27, %v388_v16  ;;  %v464_v29 = vpop.permute.xlu1 %463  ;;  %v324_v16 = vld [vmem:[%s1228_s5] sm:$0xf] }
 0x1a0   : > { %396 = vst [vmem:[#allocation3] sm:$0xf0] %v392_v28  ;;  %v468_v30 = vsel %vm467_vm1, %v462_v17, %v464_v29  ;;  %v469_v31 = vsel %vm467_vm1, %v464_v29, %v466_v14 }
 0x1a1   : > { %472 = vst [vmem:[#allocation3 + $0x20] sm:$0xf] %v468_v30  ;;  %473 = vst [vmem:[#allocation3 + $0x28] sm:$0xf] %v469_v31 }
 0x1a2   : > { %v494_v32 = vpop.permute.xlu0 %493 }
 0x1a3   : > { %v492_v33 = vpop.permute.xlu1 %491 }
 0x1a4   : > { %v497_v34 = vsel %vm495_vm2, %v492_v33, %v494_v32 }
 0x1a5   : > { %501 = vst [vmem:[#allocation3 + $0x28] sm:$0xf0] %v497_v34 }
 0x1a6   : > { %v418_v35 = vpop.permute.xlu0 %417 }
 0x1a7   : > { %v422_v36 = vsel %vm421_vm3, %v416_v26, %v418_v35  ;;  %v423_v37 = vsel %vm421_vm3, %v418_v35, %v420_v24  ;;  %v517_v38 = vpop.permute.xlu1 %516  ;;  %v575_v55 = vld [vmem:[#allocation3] sm:$0xff] }
 0x1a8   : > { %426 = vst [vmem:[#allocation3 + $0x10] sm:$0xf] %v422_v36  ;;  %427 = vst [vmem:[#allocation3 + $0x18] sm:$0xf] %v423_v37 }
 0x1aa   : > { %v444_v39 = vpop.permute.xlu0 %443 }
 0x1ab   : > { %v450_v40 = vsel %vm449_vm4, %v444_v39, %v446_v25  ;;  %v448_v41 = vpop.permute.xlu1 %447 }
 0x1ac   : > { %454 = vst [vmem:[#allocation3 + $0x10] sm:$0xf0] %v450_v40  ;;  %v451_v42 = vsel %vm449_vm4, %v446_v25, %v448_v41  ;;  %v580_v61 = vld [vmem:[#allocation3 + $0x28] sm:$0xff] }
 0x1ad   : > { %455 = vst [vmem:[#allocation3 + $0x18] sm:$0xf0] %v451_v42 }
 0x1ae   : > { %v490_v43 = vpop.permute.xlu0 %489 }
 0x1af   : > { %v496_v44 = vsel %vm495_vm2, %v490_v43, %v492_v33  ;;  %v519_v45 = vpop.permute.xlu1 %518 }
 0x1b0   : > { %500 = vst [vmem:[#allocation3 + $0x20] sm:$0xf0] %v496_v44  ;;  %v523_v46 = vsel %vm522_vm5, %v517_v38, %v519_v45  ;;  %v524_v47 = vsel %vm522_vm5, %v519_v45, %v521_v18 }
 0x1b1   : > { %527 = vst [vmem:[#allocation3 + $0x30] sm:$0xf] %v523_v46  ;;  %528 = vst [vmem:[#allocation3 + $0x38] sm:$0xf] %v524_v47 }
 0x1b2   : > { %v536_v48 = vpop.permute.xlu0 %535 }
 0x1b3   : > { %v542_v49 = vsel %vm541_vm0, %v536_v48, %v538_v15  ;;  %v565_v50 = vpop.permute.xlu1 %564  ;;  %v577_v51 = vld [vmem:[#allocation3 + $0x10] sm:$0xff] }
 0x1b4   : > { %546 = vst [vmem:[#allocation3 + $0x30] sm:$0xf0] %v542_v49  ;;  %v578_v53 = vld [vmem:[#allocation3 + $0x18] sm:$0xff]  ;;  %v872_v57 = vpack.c.bf16 %v577_v51, %v575_v55 }
 0x1b5   : > { %v870_v54 = vpack.c.bf16 %v578_v53, %v576_v52 }
 0x1b6   : > { %v567_v56 = vpop.permute.xlu0 %566 }
 0x1b7   : > { %v570_v58 = vsel %vm568_vm6, %v565_v50, %v567_v56  ;;  %871 = vmatprep.subr.bf16.mxu0 %v870_v54  ;;  %v563_v59 = vpop.permute.xlu1 %562  ;;  %v579_v0 = vld [vmem:[#allocation3 + $0x20] sm:$0xff] }
 0x1b8   : > { %574 = vst [vmem:[#allocation3 + $0x48] sm:$0xf] %v570_v58  ;;  %v569_v60 = vsel %vm568_vm6, %v563_v59, %v565_v50  ;;  %873 = vmatpush1.bf16.msra.mxu0 %v872_v57  ;;  %v582_v62 = vld [vmem:[#allocation3 + $0x38] sm:$0xff] }
 0x1b9   : > { %573 = vst [vmem:[#allocation3 + $0x40] sm:$0xf] %v569_v60  ;;  %v874_v63 = vpack.c.bf16 %v582_v62, %v580_v61 }
 0x1bb   : > { %875 = vmatprep.subr.bf16.mxu0 %v874_v63  ;;  %v581_v1 = vld [vmem:[#allocation3 + $0x30] sm:$0xff] }
 0x1bc   : > { %v876_v2 = vpack.c.bf16 %v581_v1, %v579_v0 }
 0x1be   : > { %877 = vmatpush1.bf16.msra.mxu0 %v876_v2 }
 0x1bf   : > { %v584_v3 = vld [vmem:[#allocation3 + $0x48] sm:$0xf] }
 0x1c0   : > { %857 = vmatprep.subr.msk.mxu0 %vm594_vm7, %v584_v3  ;;  %v583_v4 = vld [vmem:[#allocation3 + $0x40] sm:$0xf] }
 0x1c2   : > { %858 = vmatpush1.msk.msra.mxu0 %vm594_vm7, %v583_v4 }
 0x1c3   : > { %859 = vmatmul.mubr.msk.f32.vlgmr.msra.gmra.mrb[0].mxu0 %vm590_vm8, %v322_v5 }
 0x1c7   : > { %v588_v7 = vpop.permute.xlu0 %587 }
 0x1c8   : > { %v679_v17 = vpop.permute.xlu1 %678 }
 0x296   : > { %v667_v8 = vpop.f32.mrb[0].mxu0 }
 0x297   : > { %v668_v9 = vadd.f32 %v667_v8, %v588_v7  ;;  %v669_v10 = vpop.f32.mrb[1].mxu0 }
 0x298   : > { %v670_v11 = vadd.f32 %v669_v10, %v588_v7 }
 0x299   : > { %v672_v12 = vmul.f32 0.01, %v668_v9 }
 0x29a   : > { %v673_v13 = vmul.f32 0.01, %v670_v11 }
 0x29b   : > { %v674_v15 = vmax.f32 %v668_v9, %v672_v12 }
 0x29c   : > { %v675_v14 = vmax.f32 %v670_v11, %v673_v13 }
 0x29e   : > { %860 = vmatprep.subr.msk.mxu1 %vm594_vm7, %v675_v14 }
 0x29f   : > { %861 = vmatpush1.msk.msra.mxu1 %vm594_vm7, %v674_v15 }
 0x2a0   : > { %862 = vmatmul.mubr.msk.f32.vlgmr.msra.gmra.mrb[0].mxu1 %vm681_vm9, %v324_v16 }
 0x373   : > { %v757_v18 = vpop.f32.mrb[0].mxu1 }
 0x374   : > { %v758_v20 = vadd.f32 %v757_v18, %v679_v17  ;;  %v759_v21 = vpop.f32.mrb[1].mxu1 }
 0x375   : > { %v760_v23 = vadd.f32 %v759_v21, %v679_v17 }
 0x376   : > { %v765_v24 = vadd.f32 %v758_v20, %v1122_v22 }
 0x377   : > { %v766_v25 = vadd.f32 %v763_v19, %v760_v23 }
 0x379   : > { %v769_v26 = vcombine.low %v765_v24, %v766_v25 }
 0x37b   : > { %771 = vst [vmem:[%s271_s19] sm:$0xff] %v769_v26 }
 0x37c   : > { %953 = shalt.err (!%p950_p3)
}
 0x37d   : > { %s954_s14 = scalar_lea.hbm %s1181_s23, 128  ;;  %s958_s17 = scalar_lea.hbm %s1230_s7, 256 }
 0x37e   : > { %p955_p4 = scmp.ne.s32.totalorder %s1181_s23, %s954_s14  ;;  %p959_p9 = scmp.lt.u32.totalorder %s1181_s23, %s1230_s7 }
 0x37f   : > { %p960_p10 = scmp.lt.u32.totalorder %s958_s17, %s954_s14  ;;  %p962_p12 = scmp.lt.u32.totalorder %s954_s14, %s1181_s23 }
 0x380   : > { %p956_p7 = pnand %p955_p4, %p1100_p5 }
 0x381   : > { %p961_p11 = por %p960_p10, %p959_p9 }
 0x382   : > { %p957_p8 = pneg %p956_p7 }
 0x383   : > { %p963_p13 = por %p962_p12, %p961_p11 }
 0x385   : > { %p964_p0 = pnand %p963_p13, %p957_p8 }
 0x387   : > { %967 = shalt.err (!%p964_p0)
}
 0x388   : > { %878 = dma.vmem_to_hbm [thread:$0]  (%p1100_p5), %s1183_s20, 128, %s1181_s23, %s773_s29  }
 0x389 PF: > { %p884_p1 = scmp.ge.s32.totalorder %s1002_s27, 2  ;;  %s799_s21 = sand.u32 1, %s990_s24  }
 0x38a   : > { %s800_s22 = scalar_lea.sflag [#allocation5], %s799_s21 }
 0x38b   : > { %p881_p2 = pnand %p884_p1, %p1104_p6 }
 0x38d   : > { %985 = dma.done.wait (!%p881_p2), %s800_s22, 128  }
 0x38e   : > { %987 = vsyncadd (!%p881_p2), %s800_s22, 4294967168  ;;  %p17_p3 = scmp.ge.s32.totalorder %s1087_s30, 4   ;;  %s1233_s24 = smov %s994_s25 }
 0x38f   : > { %s1234_s25 = smov %s998_s26  ;;  %s1235_s26 = smov %s1098_s10 }
 0x390   : > { %s1236_s27 = smov %s1087_s30  ;;  %19 = sbr.rel (!%p17_p3) target bundleno = 3 (0x3), region = 83 }
 0x397   :  { %805 = vsyncpa [#allocation5], 1 }
 0x398   :  { %807 = vsyncpa [#allocation5 + $0x1], 1 }

</bundles_post_ra>
